<compile_context>
chip_gen: v6e
topology: v6e:2x2x1
jax: 0.10.0
libtpu: 0.0.40
codegen_flags: <defaults>
</compile_context>

<pallas_src>
import functools

import jax
import jax.numpy as jnp
from jax.experimental import pallas as pl
from jax.experimental.pallas import tpu as pltpu


_VMEM_LIMIT = 48 * 1024 * 1024   # explicit scoped-VMEM budget; fits v7x's 64 MiB physical VMEM


def _choose_time_chunk(t):
    """Largest chunk (<=32) that divides T: timesteps processed per grid step."""
    for cand in (32, 16, 8, 4, 2, 1):
        if t % cand == 0:
            return cand
    return 1


def _choose_row_tile(n):
    """Row tile for the projection/head matmuls (multiple of 8, or the full extent)."""
    if n <= 512:
        return n
    for cand in (512, 256, 128, 64, 32, 16, 8):
        if n % cand == 0:
            return cand
    return n


# --------------------- Projection kernel (hoisted input proj + classifier head) ---------------------

def _proj_kernel(x_ref, w_ref, b_ref, o_ref):
    # x_ref: (n_di, TN, F)    direction-major activations (rows = flattened T*B)
    # w_ref: (1, n_di, F, G)  weights for this output direction, split per input direction
    # b_ref: (1, 1, G)
    # o_ref: (1, TN, G)       G is a multiple of 128 -> lane-dense, unmasked stores
    n_di = x_ref.shape[0]
    acc = jnp.dot(x_ref[0], w_ref[0, 0], preferred_element_type=jnp.float32)
    for di in range(1, n_di):
        acc = acc + jnp.dot(x_ref[di], w_ref[0, di],
                            preferred_element_type=jnp.float32)
    o_ref[0] = acc + b_ref[0]


def proj(x_dm, w_st, b_st):
    """out[do] = sum_di x_dm[di] @ w_st[do, di] + b_st[do].

    x_dm: (n_di, N, F); w_st: (n_do, n_di, F, G); b_st: (n_do, 1, G) -> (n_do, N, G).
    """
    n_di, N, F = x_dm.shape
    n_do, _, _, G = w_st.shape
    TN = _choose_row_tile(N)
    return pl.pallas_call(
        _proj_kernel,
        out_shape=jax.ShapeDtypeStruct((n_do, N, G), jnp.float32),
        grid_spec=pltpu.PrefetchScalarGridSpec(
            num_scalar_prefetch=0,
            grid=(n_do, N // TN),
            in_specs=[
                pl.BlockSpec((n_di, TN, F), lambda do, n: (0, n, 0)),
                pl.BlockSpec((1, n_di, F, G), lambda do, n: (do, 0, 0, 0)),
                pl.BlockSpec((1, 1, G), lambda do, n: (do, 0, 0)),
            ],
            out_specs=pl.BlockSpec((1, TN, G), lambda do, n: (do, n, 0)),
        ),
        compiler_params=pltpu.CompilerParams(
            dimension_semantics=("parallel", "parallel"),
            vmem_limit_bytes=_VMEM_LIMIT),
    )(x_dm, w_st, b_st)


# --------------------------- Fused bidirectional LSTM recurrence ---------------------------

def _bilstm_kernel(gates_ref, whh_ref, hout_ref, h_scr, c_scr, *, n_dir):
    # gates_ref: (1, TT, B, 4H)  precomputed x@W_ih + bias for this (direction, time chunk)
    # whh_ref:   (1, H, 4H)      hidden->gates weight for this direction
    # hout_ref:  (1, TT, B, H)
    # h_scr/c_scr: (B, H)        recurrent state carried across time chunks in VMEM
    tt = gates_ref.shape[1]
    H = whh_ref.shape[1]
    d = pl.program_id(0)
    t = pl.program_id(1)

    @pl.when(t == 0)
    def _init():
        h_scr[...] = jnp.zeros(h_scr.shape, h_scr.dtype)
        c_scr[...] = jnp.zeros(c_scr.shape, c_scr.dtype)

    whh = whh_ref[0]   # (H, 4H)

    def run_chunk(reverse):
        h = h_scr[...]
        c = c_scr[...]
        steps = range(tt - 1, -1, -1) if reverse else range(tt)
        for s in steps:                       # static, fully unrolled inner time loop
            gates = gates_ref[0, s] + jnp.dot(h, whh,
                                              preferred_element_type=jnp.float32)
            # PyTorch gate order: i, f, g, o.
            # NOTE: with H < 128 these slices are sub-vreg; production configs should
            # keep H a multiple of 128 so each gate is a full lane-aligned vreg.
            i_g = jax.nn.sigmoid(gates[:, 0 * H:1 * H])
            f_g = jax.nn.sigmoid(gates[:, 1 * H:2 * H])
            g_g = jnp.tanh(gates[:, 2 * H:3 * H])
            o_g = jax.nn.sigmoid(gates[:, 3 * H:4 * H])
            c = f_g * c + i_g * g_g
            h = o_g * jnp.tanh(c)
            hout_ref[0, s] = h
        h_scr[...] = h
        c_scr[...] = c

    if n_dir == 1:
        run_chunk(False)
    else:
        @pl.when(d == 0)
        def _fwd():
            run_chunk(False)

        @pl.when(d == 1)
        def _bwd():
            run_chunk(True)


def bilstm(gates, w_hh_st, tt):
    """Fused bidirectional LSTM recurrence.

    gates:   (n_dir, T, B, 4H) precomputed input projections (+bias)
    w_hh_st: (n_dir, H, 4H)
    returns  (n_dir, T, B, H)
    """
    n_dir, T, B, G4 = gates.shape
    H = w_hh_st.shape[1]
    nT = T // tt
    return pl.pallas_call(
        functools.partial(_bilstm_kernel, n_dir=n_dir),
        out_shape=jax.ShapeDtypeStruct((n_dir, T, B, H), jnp.float32),
        grid_spec=pltpu.PrefetchScalarGridSpec(
            num_scalar_prefetch=0,
            grid=(n_dir, nT),
            in_specs=[
                # Backward direction (d == 1) walks the time chunks in reverse purely
                # via the index_map -- no materialized x[::-1] HBM copy.
                pl.BlockSpec((1, tt, B, G4),
                             lambda d, t: (d, t + d * (nT - 1 - 2 * t), 0, 0)),
                pl.BlockSpec((1, H, G4), lambda d, t: (d, 0, 0)),
            ],
            out_specs=pl.BlockSpec((1, tt, B, H),
                                   lambda d, t: (d, t + d * (nT - 1 - 2 * t), 0, 0)),
            scratch_shapes=[
                pltpu.VMEM((B, H), jnp.float32),
                pltpu.VMEM((B, H), jnp.float32),
            ],
        ),
        compiler_params=pltpu.CompilerParams(
            # direction axis "parallel": sharded across the 2 TensorCores on v7x;
            # time axis "arbitrary": sequential carry of h/c in scratch.
            dimension_semantics=("parallel", "arbitrary"),
            vmem_limit_bytes=_VMEM_LIMIT),
    )(gates, w_hh_st)


# ----------------------------- SlotTagging forward -----------------------------

def slot_tagging_forward(params, token_ids):
    """token_ids: (B, T) int32 -> logits (B, num_class, T)  (matches PyTorch permute(0,2,1))."""
    B, T = token_ids.shape
    H = params["hidden"]
    n_dir = params["n_dir"]
    C = params["num_class"]

    # Embedding lookup (glue: gather has no clean rectangular-BlockSpec expression).
    x = jnp.take(params["embeddings"], token_ids, axis=0)        # (B, T, E)
    # self.drop(output): identity at inference.  # TODO(synk): training-mode dropout

    x = jnp.transpose(x, (1, 0, 2))                              # time-major (T, B, E)
    E = x.shape[-1]
    x_dm = x.reshape(1, T * B, E)                                # direction-major (n_di=1, N, E)

    tt = _choose_time_chunk(T)

    for layer in params["lstm"]:
        # Hoisted input projection: one big lane-dense matmul covering both directions.
        gates = proj(x_dm, layer["w_ih_st"], layer["b_st"])      # (n_dir, T*B, 4H)
        gates = gates.reshape(n_dir, T, B, 4 * H)                # free reshape
        hout = bilstm(gates, layer["w_hh_st"], tt)               # (n_dir, T, B, H)
        x_dm = hout.reshape(n_dir, T * B, H)                     # stay direction-major: no concat
        # inter-layer dropout: identity at inference.

    # Classifier head (reuses the projection kernel; output padded to 128 lanes).
    logits = proj(x_dm, params["lin_w_st"], params["lin_b_st"])  # (1, T*B, C_pad)
    logits = logits[0, :, :C].reshape(T, B, C)
    # output.permute(0, 2, 1) on the PyTorch (B, T, C) layout.
    return jnp.transpose(logits, (1, 2, 0))                      # (B, num_class, T)


# ----------------------------- Deterministic parameter init -----------------------------

def init_params(key, vocab, embed_dim, hidden, num_layers, bidirectional, num_class):
    n_dir = 2 if bidirectional else 1
    c_pad = ((num_class + 127) // 128) * 128
    keys = iter(jax.random.split(key, 1 + 3 * num_layers + 2))

    def rnd(shape, scale=0.1):
        return jax.random.normal(next(keys), shape, dtype=jnp.float32) * scale

    params = {
        "hidden": hidden,
        "n_dir": n_dir,
        "num_class": num_class,
        "embeddings": rnd((vocab, embed_dim)),
    }

    lstm = []
    for layer_idx in range(num_layers):
        n_di = 1 if layer_idx == 0 else n_dir
        f_per_di = embed_dim if layer_idx == 0 else hidden
        lstm.append({
            # PyTorch weight_ih_l{k}[_reverse].T with its rows split per input direction.
            "w_ih_st": rnd((n_dir, n_di, f_per_di, 4 * hidden)),
            # PyTorch weight_hh_l{k}[_reverse].T
            "w_hh_st": rnd((n_dir, hidden, 4 * hidden)),
            # Combined bias b_ih + b_hh per direction.
            "b_st": rnd((n_dir, 1, 4 * hidden)),
        })
    params["lstm"] = lstm

    # Linear head, split per direction and zero-padded to 128 output lanes.
    lin_w = rnd((1, n_dir, hidden, num_class))
    lin_b = rnd((1, 1, num_class))
    params["lin_w_st"] = jnp.pad(lin_w, ((0, 0), (0, 0), (0, 0), (0, c_pad - num_class)))
    params["lin_b_st"] = jnp.pad(lin_b, ((0, 0), (0, 0), (0, c_pad - num_class)))
    return params


# ----------------------------- Pure-JAX reference (for correctness check) -----------------------------

def _reference_forward(params, token_ids):
    H = params["hidden"]; n_dir = params["n_dir"]; C = params["num_class"]
    B, T = token_ids.shape
    x = jnp.take(params["embeddings"], token_ids, axis=0)
    x = jnp.transpose(x, (1, 0, 2))
    x_dm = x[None]                                               # (1, T, B, E)
    for layer in params["lstm"]:
        w_ih, w_hh, b = layer["w_ih_st"], layer["w_hh_st"], layer["b_st"]
        n_di = w_ih.shape[1]
        outs = []
        for d in range(n_dir):
            gx = sum(jnp.einsum("tbf,fg->tbg", x_dm[di], w_ih[d, di])
                     for di in range(n_di)) + b[d]
            h = jnp.zeros((B, H), jnp.float32)
            c = jnp.zeros((B, H), jnp.float32)
            hs = [None] * T
            order = range(T) if d == 0 else range(T - 1, -1, -1)
            for t in order:
                gates = gx[t] + h @ w_hh[d]
                i = jax.nn.sigmoid(gates[:, 0 * H:1 * H])
                f = jax.nn.sigmoid(gates[:, 1 * H:2 * H])
                g = jnp.tanh(gates[:, 2 * H:3 * H])
                o = jax.nn.sigmoid(gates[:, 3 * H:4 * H])
                c = f * c + i * g
                h = o * jnp.tanh(c)
                hs[t] = h
            outs.append(jnp.stack(hs, axis=0))
        x_dm = jnp.stack(outs, axis=0)
    w, bb = params["lin_w_st"][0], params["lin_b_st"][0]
    flat = x_dm.reshape(n_dir, T * B, H)
    logits = sum(flat[d] @ w[d] for d in range(n_dir)) + bb
    logits = logits[:, :C].reshape(T, B, C)
    return jnp.transpose(logits, (1, 2, 0))


# ----------------------------- Main -----------------------------

if __name__ == "__main__":
    VOCAB, EMBED, HIDDEN = 50, 32, 32
    NUM_LAYERS, BIDIR, NUM_CLASS = 2, True, 10
    B, T = 2, 8

    key = jax.random.PRNGKey(0)
    k_param, k_tok = jax.random.split(key)

    params = init_params(k_param, VOCAB, EMBED, HIDDEN,
                         NUM_LAYERS, BIDIR, NUM_CLASS)
    token_ids = jax.random.randint(k_tok, (B, T), 0, VOCAB, dtype=jnp.int32)

    out = slot_tagging_forward(params, token_ids)
    out = jax.block_until_ready(out)

    assert out.shape == (B, NUM_CLASS, T), out.shape
    assert out.dtype == jnp.float32

    with jax.default_matmul_precision("highest"):
        ref = _reference_forward(params, token_ids)
    err = float(jnp.max(jnp.abs(out - ref)))
    assert err < 2e-3, f"max abs error vs reference: {err}"

    print("KERNEL_OK")
</pallas_src>

<mosaic_0001>
module attributes {stable_mosaic.version = 11 : i64} {
  func.func @_proj_kernel(%arg0: i32, %arg1: i32, %arg2: memref<1x16x32xf32, #tpu.memory_space<vmem>>, %arg3: memref<1x1x32x128xf32, #tpu.memory_space<vmem>>, %arg4: memref<1x1x128xf32, #tpu.memory_space<vmem>>, %arg5: memref<1x16x128xf32, #tpu.memory_space<vmem>>) attributes {dimension_semantics = [#tpu.dimension_semantics<parallel>, #tpu.dimension_semantics<parallel>], iteration_bounds = array<i64: 2, 1>, scalar_prefetch = 0 : i64, scratch_operands = 0 : i64, tpu.core_type = #tpu.core_type<tc>, window_params = [{transform_indices = @transform_0, window_bounds = array<i64: 1, 16, 32>}, {transform_indices = @transform_1, window_bounds = array<i64: 1, 1, 32, 128>}, {transform_indices = @transform_2, window_bounds = array<i64: 1, 1, 128>}, {transform_indices = @transform_3, window_bounds = array<i64: 1, 16, 128>}]} {
    %c0 = arith.constant 0 : index
    %c0_0 = arith.constant 0 : index
    %c0_1 = arith.constant 0 : index
    %0 = vector.load %arg2[%c0, %c0_0, %c0_1] : memref<1x16x32xf32, #tpu.memory_space<vmem>>, vector<1x16x32xf32>
    %1 = vector.shape_cast %0 : vector<1x16x32xf32> to vector<16x32xf32>
    %c0_2 = arith.constant 0 : index
    %c0_3 = arith.constant 0 : index
    %c0_4 = arith.constant 0 : index
    %c0_5 = arith.constant 0 : index
    %2 = vector.load %arg3[%c0_2, %c0_3, %c0_4, %c0_5] : memref<1x1x32x128xf32, #tpu.memory_space<vmem>>, vector<1x1x32x128xf32>
    %3 = vector.shape_cast %2 : vector<1x1x32x128xf32> to vector<32x128xf32>
    %cst = arith.constant dense<0.000000e+00> : vector<16x128xf32>
    %4 = tpu.matmul %1, %3, %cst {dimension_numbers = #tpu.dot_dimension_numbers<[1], [0], [0], [1], [0, 0, 1, 1], [], []>} : vector<16x32xf32>, vector<32x128xf32>, vector<16x128xf32> -> vector<16x128xf32>
    %c0_6 = arith.constant 0 : index
    %c0_7 = arith.constant 0 : index
    %c0_8 = arith.constant 0 : index
    %5 = vector.load %arg4[%c0_6, %c0_7, %c0_8] : memref<1x1x128xf32, #tpu.memory_space<vmem>>, vector<1x1x128xf32>
    %6 = vector.shape_cast %5 : vector<1x1x128xf32> to vector<1x128xf32>
    %7 = vector.broadcast %6 : vector<1x128xf32> to vector<16x128xf32>
    %8 = arith.addf %4, %7 : vector<16x128xf32>
    %c0_9 = arith.constant 0 : index
    %c0_10 = arith.constant 0 : index
    %c0_11 = arith.constant 0 : index
    %9 = vector.load %arg5[%c0_9, %c0_10, %c0_11] : memref<1x16x128xf32, #tpu.memory_space<vmem>>, vector<1x16x128xf32>
    %10 = vector.shape_cast %9 : vector<1x16x128xf32> to vector<16x128xf32>
    %11 = vector.shape_cast %8 : vector<16x128xf32> to vector<1x16x128xf32>
    tpu.vector_store %arg5[%c0_9, %c0_10, %c0_11], %11 {strides = array<i32>} : memref<1x16x128xf32, #tpu.memory_space<vmem>>, vector<1x16x128xf32>,
    return
  }
  func.func @transform_0(%arg0: i32, %arg1: i32) -> (i32, i32, i32) {
    %c0_i32 = arith.constant 0 : i32
    %c0_i32_0 = arith.constant 0 : i32
    %c0_i32_1 = arith.constant 0 : i32
    return %c0_i32, %arg1, %c0_i32_0 : i32, i32, i32
  }
  func.func @transform_1(%arg0: i32, %arg1: i32) -> (i32, i32, i32, i32) {
    %c0_i32 = arith.constant 0 : i32
    %c0_i32_0 = arith.constant 0 : i32
    %c0_i32_1 = arith.constant 0 : i32
    %c0_i32_2 = arith.constant 0 : i32
    return %arg0, %c0_i32, %c0_i32_0, %c0_i32_1 : i32, i32, i32, i32
  }
  func.func @transform_2(%arg0: i32, %arg1: i32) -> (i32, i32, i32) {
    %c0_i32 = arith.constant 0 : i32
    %c0_i32_0 = arith.constant 0 : i32
    %c0_i32_1 = arith.constant 0 : i32
    return %arg0, %c0_i32, %c0_i32_0 : i32, i32, i32
  }
  func.func @transform_3(%arg0: i32, %arg1: i32) -> (i32, i32, i32) {
    %c0_i32 = arith.constant 0 : i32
    %c0_i32_0 = arith.constant 0 : i32
    return %arg0, %arg1, %c0_i32 : i32, i32, i32
  }
}

</mosaic_0001>

<bundles_post_ra>
// kernel: tpu_custom_call.1
= control target key start
LH: loop header
LB: loop body
LE: loop exit
PB: predicated region body
PF: predicated region fallthrough
CT: control target
= control target key end

     0   :  { %8 = vsyncpa [#allocation3], 0  ;;  %s940_s0 = inlined_call_operand.hbm [shape: f32[1,16,32], index: 0, kind: input, shape index: {}]   ;;  %s941_s1 = inlined_call_operand.hbm [shape: f32[2,1,32,128], index: 1, kind: input, shape index: {}]   ;;  %s942_s2 = inlined_call_operand.vmem [shape: f32[2,1,128], index: 2, kind: input, shape index: {}]   ;;  %s943_s3 = inlined_call_operand.hbm [shape: f32[2,16,128], index: 3, kind: output, shape index: {}]  }
   0x1   :  { %9 = vsyncpa [#allocation6], 0 }
   0x2   :  { %11 = vsyncpa [#allocation6 + $0x1], 0 }
   0x3   :  { %12 = vsyncpa [#allocation4], 0 }
   0x4   :  { %14 = vsyncpa [#allocation4 + $0x1], 0  ;;  %s745_s12 = smov 0   ;;  %s747_s13 = smov 0  }
   0x5   :  { %s749_s14 = smov 0   ;;  %s751_s15 = smov 0  }
   0x6   :  { %s753_s16 = smov 0   ;;  %s755_s17 = smov 0  }
   0x7 LB: > { %s462_s18 = sadd.s32 4294967295, %s716_s17   ;;  %s463_s19 = sadd.s32 4294967294, %s716_s17   ;;  %s716_s17 = sphi %s755_s17, %s20_s17   ;;  %s712_s16 = sphi %s753_s16, %s965_s16   ;;  %s708_s15 = sphi %s751_s15, %s964_s15   ;;  %s704_s14 = sphi %s749_s14, %s963_s14   ;;  %s700_s13 = sphi %s747_s13, %s962_s13   ;;  %s696_s12 = sphi %s745_s12, %s961_s12  }
   0x8   : > { %p78_p0 = scmp.ne.s32.totalorder %s700_s13, %s696_s12  ;;  %p779_p1 = scmp.eq.s32.totalorder %s462_s18, 0 }
   0x9   : > { %p783_p2 = scmp.eq.s32.totalorder %s462_s18, 1  ;;  %p136_p3 = scmp.eq.s32.totalorder %s463_s19, 1 }
   0xa   : > { %p789_p4 = por %p779_p1, %p78_p0  ;;  %p464_p5 = scmp.ge.s32.totalorder %s716_s17, 1 }
   0xb   : > { %p794_p6 = por %p136_p3, %p78_p0  ;;  %p143_p7 = scmp.lt.s32.totalorder %s716_s17, 3 }
   0xc   : > { %s949_s22 = scalar_select %p789_p4, 1, 0 }
   0xd   : > { %s950_s23 = scalar_select %p794_p6, 1, 0 }
   0xe   : > { %p799_p8 = pnand %p464_p5, %p143_p7  ;;  %s718_s25 = smov [#allocation2]  }
   0xf   : > { %s158_s26 = sshll.u32 %s718_s25, 4  ;;  %s32_s28 = sadd.s32 1, %s712_s16  ;;  %s159_s26 = int_to_ptr.vmem [resolvable:$true] %s158_s26 }
  0x10   : > { %p509_p9 = pneg %p799_p8  ;;  %s589_s29 = scalar_lea.vmem %s159_s26, 256 }
  0x11   : > { %p590_p13 = scmp.ne.s32.totalorder %s159_s26, %s589_s29  ;;  %p597_p5 = scmp.lt.s32.totalorder %s159_s26, %s159_s26 }
  0x12   : > { %p808_p11 = pnand %p509_p9, %p779_p1  ;;  %p598_p7 = scmp.lt.s32.totalorder %s589_s29, %s589_s29 }
  0x14   : > { %p580_p12 = pneg %p808_p11  ;;  %p599_p6 = por %p598_p7, %p597_p5 }
  0x16   : > { %p592_p0 = pnand %p590_p13, %p580_p12 }
  0x18   : > { %p593_p3 = pneg %p592_p0 }
  0x1a   : > { %p600_p4 = pnand %p599_p6, %p593_p3 }
  0x1c   : > { %603 = shalt.err (!%p600_p4)
}
  0x1d   : > { %s945_s30 = smov 128   ;;  %s946_s4 = smov 8  }
  0x1e   : > { %512 = dma.hbm_to_vmem [thread:$0]  (!%p808_p11), %s940_s0, 256, %s159_s26, [#allocation3], %s945_s30, %s945_s30, %s946_s4  }
  0x1f   : > { %p34_p4 = scmp.ge.s32.totalorder %s32_s28, 2  ;;  %s65_s7 = sadd.s32 1, %s704_s14 }
  0x20   : > { %p72_p6 = scmp.ne.s32.totalorder %s704_s14, %s700_s13  ;;  %p73_p9 = scmp.eq.s32.totalorder %s716_s17, 0 }
  0x21   : > { %s967_s28 = smov (%p34_p4, %s32_s28), 0  ;;  %p522_p0 = scmp.lt.s32.totalorder %s716_s17, 2 }
  0x22   : > { %p829_p12 = por %p73_p9, %p72_p6  ;;  %p835_p13 = por %p783_p2, %p72_p6 }
  0x23   : > { %s62_s10 = ssub.s32 %s712_s16, %s967_s28  ;;  %s172_s11 = sand.u32 1, %s704_s14  }
  0x24   : > { %p63_p11 = scmp.eq.s32.totalorder %s62_s10, 0  ;;  %s467_s18 = sshll.u32 %s172_s11, 5 }
  0x25   : > { %s482_s25 = sshll.u32 %s712_s16, 9  ;;  %s176_s5 = scalar_lea.vmem [#allocation5], %s467_s18 }
  0x26   : > { %s844_s19 = scalar_select %p63_p11, %s704_s14, %s65_s7  }
  0x27   : > { %s182_s29 = scalar_lea.hbm %s941_s1, %s482_s25  ;;  %s183_s6 = sshll.u32 %s176_s5, 4  ;;  %s184_s6 = int_to_ptr.vmem [resolvable:$true] %s183_s6 }
  0x28   : > { %p852_p2 = pnand %p522_p0, %p829_p12  ;;  %s173_s30 = scalar_lea.sflag [#allocation6], %s172_s11 }
  0x29   : > { %s617_s10 = scalar_lea.vmem %s184_s6, 512  ;;  %s721_s7 = smov [#allocation5]  }
  0x2a   : > { %p606_p3 = pneg %p852_p2  ;;  %p618_p5 = scmp.ne.s32.totalorder %s184_s6, %s617_s10 }
  0x2b   : > { %s622_s4 = sshll.u32 %s721_s7, 4  ;;  %s623_s4 = int_to_ptr.vmem [resolvable:$false] %s622_s4 }
  0x2c   : > { %p620_p7 = pnand %p618_p5, %p606_p3  ;;  %s624_s25 = scalar_lea.vmem %s623_s4, 1024 }
  0x2d   : > { %p625_p6 = scmp.lt.s32.totalorder %s184_s6, %s623_s4  ;;  %p626_p9 = scmp.lt.s32.totalorder %s624_s25, %s617_s10 }
  0x2e   : > { %p621_p4 = pneg %p620_p7 }
  0x2f   : > { %p627_p11 = por %p626_p9, %p625_p6 }
  0x31   : > { %p628_p10 = pnand %p627_p11, %p621_p4 }
  0x33   : > { %631 = shalt.err (!%p628_p10)
}
  0x34   : > { %s956_s8 = smov 8   ;;  %s957_s18 = smov 128  }
  0x35   : > { %516 = dma.hbm_to_vmem [thread:$0]  (!%p852_p2), %s182_s29, 512, %s184_s6, %s173_s30, %s957_s18, %s957_s18, %s956_s8  }
  0x36   : > { %201 = sbr.rel (%p799_p8) target bundleno = 284 (0x11c), region = 32 }
  0x3b   : > { %683 = dma.done.wait (%p779_p1), [#allocation3], 256  }
  0x3c   : > { %685 = vsyncadd (%p779_p1), [#allocation3], 4294967040  ;;  %s870_s4 = sand.u32 1, %s700_s13   ;;  %p958_p10 = scmp.ne.s32.totalorder %s949_s22, 0 }
  0x3d   : > { %s472_s11 = sshll.u32 %s870_s4, 5  ;;  %s208_s26 = scalar_lea.sflag [#allocation6], %s870_s4 }
  0x3e   : > { %s211_s27 = scalar_lea.vmem [#allocation5], %s472_s11 }
  0x3f   : > { %687 = dma.done.wait (%p958_p10), %s208_s26, 512  }
  0x40   : > { %689 = vsyncadd (%p958_p10), %s208_s26, 4294966784  ;;  %vm255_vm0 = vcmask 261120   ;;  %v247_v0 = vld [vmem:[%s211_s27 + $0x18] sm:$0xff]  ;;  %v246_v1 = vld [vmem:[%s211_s27 + $0x10] sm:$0xff]  ;;  %p238_p1 = scmp.lt.s32.totalorder %s708_s15, 1  ;;  %s473_s22 = sshll.u32 %s870_s4, 4 }
  0x41   : > { %490 = vmatprep.subr.mxu0 %v247_v0  ;;  %v242_v2 = vld [vmem:[#allocation2] sm:$0xff]  ;;  %v245_v3 = vld [vmem:[%s211_s27 + $0x8] sm:$0xff]  ;;  %v244_v4 = vld [vmem:[%s211_s27] sm:$0xff]  ;;  %s236_s5 = scalar_lea.vmem [#allocation7], %s473_s22  ;;  %s483_s21 = sshll.u32 %s708_s15, 8 }
  0x42   : > { %491 = vmatpush3.msra.mxu0 %v247_v0  ;;  %498 = vmatprep.mubr.msk.f32.mxu0 %vm255_vm0, %v242_v2  ;;  %v243_v5 = vld [vmem:[#allocation2 + $0x8] sm:$0xff]  ;;  %s239_s20 = scalar_select %p238_p1, %s708_s15, 1 }
  0x43   : > { %492 = vmatprep.subr.mxu0 %v246_v1  ;;  %s355_s6 = sshll.u32 %s236_s5, 4  ;;  %s892_s25 = scalar_lea.hbm %s943_s3, %s483_s21  ;;  %s887_s6 = int_to_ptr.vmem [resolvable:$true] %s355_s6 }
  0x44   : > { %493 = vmatpush3.msra.mxu0 %v246_v1  ;;  %s240_s29 = scalar_lea.vmem %s942_s2, %s239_s20  ;;  %s340_s8 = scalar_lea.sflag [#allocation4], %s870_s4 }
  0x45   : > { %494 = vmatprep.subr.mxu0 %v245_v3  ;;  %v474_v6 = vld [vmem:[%s240_s29] ss:$0 sm:$0xff]  ;;  %s632_s18 = scalar_lea.vmem %s887_s6, 256  ;;  %s722_s15 = smov [#allocation7]  }
  0x46   : > { %495 = vmatpush3.msra.mxu0 %v245_v3  ;;  %p633_p8 = scmp.ne.s32.totalorder %s887_s6, %s632_s18  ;;  %s636_s11 = sshll.u32 %s722_s15, 4  ;;  %s637_s11 = int_to_ptr.vmem [resolvable:$false] %s636_s11 }
  0x47   : > { %496 = vmatprep.subr.mxu0 %v244_v4  ;;  %s638_s26 = scalar_lea.vmem %s637_s11, 512  ;;  %p639_p2 = scmp.lt.s32.totalorder %s887_s6, %s637_s11 }
  0x48   : > { %497 = vmatpush3.msra.mxu0 %v244_v4  ;;  %p634_p12 = pnand %p633_p8, %p835_p13  ;;  %p640_p3 = scmp.lt.s32.totalorder %s638_s26, %s632_s18 }
  0x49   : > { %499 = vmatmul.mubr.msk.f32.vlgmr.msra.gmra.mxu0 %vm255_vm0, %v243_v5 }
  0x4a   : > { %p635_p0 = pneg %p634_p12  ;;  %p641_p5 = por %p640_p3, %p639_p2 }
  0x4c   : > { %p642_p7 = pnand %p641_p5, %p635_p0 }
 0x109   : > { %v500_v7 = vpop.f32.mrf.mxu0 }
 0x10a   : > { %v334_v8 = vadd.f32 %v500_v7, %v474_v6 }
 0x10b   : > { %v328_v9 = vpop.f32.mrf.mxu0 }
 0x10c   : > { %338 = vst [vmem:[%s236_s5 + $0x8] sm:$0xff] %v334_v8  ;;  %v329_v10 = vadd.f32 %v474_v6, %v328_v9 }
 0x10e   : > { %337 = vst [vmem:[%s236_s5] sm:$0xff] %v329_v10 }
 0x10f   : > { %645 = shalt.err (!%p642_p7)
}
 0x110   : > { %s646_s27 = scalar_lea.hbm %s892_s25, 256  ;;  %s650_s24 = scalar_lea.hbm %s943_s3, 512 }
 0x111   : > { %p647_p4 = scmp.ne.s32.totalorder %s892_s25, %s646_s27  ;;  %p651_p11 = scmp.lt.s32.totalorder %s892_s25, %s943_s3 }
 0x112   : > { %p652_p10 = scmp.lt.s32.totalorder %s650_s24, %s646_s27 }
 0x113   : > { %p648_p6 = pnand %p647_p4, %p835_p13 }
 0x114   : > { %p653_p1 = por %p652_p10, %p651_p11 }
 0x115   : > { %p649_p9 = pneg %p648_p6 }
 0x117   : > { %p654_p8 = pnand %p653_p1, %p649_p9 }
 0x119   : > { %657 = shalt.err (!%p654_p8)
}
 0x11a   : > { %s723_s5 = smov 128   ;;  %s724_s21 = smov 8  }
 0x11b   : > { %507 = dma.vmem_to_hbm [thread:$0]  (%p835_p13), %s887_s6, 256, %s892_s25, %s340_s8, %s723_s5, %s723_s5, %s724_s21  }
 0x11c PF: > { %s370_s10 = sand.u32 1, %s696_s12   ;;  %p959_p12 = scmp.ne.s32.totalorder %s950_s23, 0 }
 0x11d   : > { %p960_p0 = scmp.ge.s32.totalorder %s716_s17, 2  ;;  %s371_s7 = scalar_lea.sflag [#allocation4], %s370_s10 }
 0x11f   : > { %p518_p2 = pnand %p960_p0, %p959_p12 }
 0x121   : > { %p519_p3 = pneg %p518_p2 }
 0x123   : > { %691 = dma.done.wait (%p519_p3), %s371_s7, 256  }
 0x124   : > { %693 = vsyncadd (%p519_p3), %s371_s7, 4294967040  ;;  %s20_s17 = sadd.s32 1, %s716_s17   ;;  %s961_s12 = smov %s700_s13 }
 0x125   : > { %p17_p5 = scmp.ge.s32.totalorder %s20_s17, 4   ;;  %s962_s13 = smov %s704_s14 }
 0x126   : > { %s963_s14 = smov %s844_s19  ;;  %s964_s15 = smov %s712_s16 }
 0x127   : > { %s965_s16 = smov %s967_s28  ;;  %19 = sbr.rel (!%p17_p5) target bundleno = 7 (0x7), region = 86 }
 0x12c   :  { %376 = vsyncpa [#allocation3], 1 }
 0x12d   :  { %378 = vsyncpa [#allocation3 + $0x1], 1 }
 0x12e   :  { %379 = vsyncpa [#allocation6], 1 }
 0x12f   :  { %381 = vsyncpa [#allocation6 + $0x1], 1 }
 0x130   :  { %382 = vsyncpa [#allocation4], 1 }
 0x131   :  { %384 = vsyncpa [#allocation4 + $0x1], 1 }

</bundles_post_ra>
